<compile_context>
chip_gen: v7x
topology: tpu7x:2x2x1
jax: 0.10.0
libtpu: 0.0.40
codegen_flags: <defaults>
</compile_context>

<pallas_src>
import functools

import jax
import jax.numpy as jnp
from jax.experimental import pallas as pl
from jax.experimental.pallas import tpu as pltpu

LANE = 128     # vreg lane width (last dim)
SUBLANE = 8    # vreg sublane width (second-to-last dim, f32)


def _round_up(n, m):
    return ((n + m - 1) // m) * m


def prepare_linear_params(W, b):
    """One-time layout fix: PyTorch (OUT, IN) weight -> padded (IN_p, OUT_p),
    bias -> padded (1, OUT_p). Zero padding keeps the matmul exact on the
    valid columns."""
    OUT, IN = W.shape
    in_p = _round_up(IN, LANE)
    out_p = _round_up(OUT, LANE)
    w_pad = (
        jnp.zeros((in_p, out_p), jnp.float32)
        .at[:IN, :OUT]
        .set(jnp.asarray(W, jnp.float32).T)
    )
    b_pad = (
        jnp.zeros((1, out_p), jnp.float32)
        .at[0, :OUT]
        .set(jnp.asarray(b, jnp.float32))
    )
    return w_pad, b_pad


@functools.partial(jax.jit, static_argnames=("negative_slope", "out_features"))
def linear_leaky_relu(x, w_pad, b_pad, negative_slope, out_features):
    """x: (N, IN) f32; w_pad: (IN_p, OUT_p) f32; b_pad: (1, OUT_p) f32.
    Returns (N, out_features) f32 == LeakyReLU(x @ W.T + b)."""
    N, IN = x.shape
    in_p, out_p = w_pad.shape
    n_p = _round_up(N, SUBLANE)
    slope = float(negative_slope)  # static: baked into the kernel as an immediate

    # Zero-pad x to a sublane/lane-aligned slab (fused by jit around the call).
    x_pad = jnp.zeros((n_p, in_p), jnp.float32).at[:N, :IN].set(x)

    def kernel(x_ref, w_ref, b_ref, o_ref):
        x_v = x_ref[...]                       # (n_p, in_p)  f32, VMEM
        w_v = w_ref[...]                       # (in_p, out_p) f32, VMEM
        b_v = b_ref[...]                       # (1, out_p)    f32, VMEM
        v1 = jnp.dot(x_v, w_v, preferred_element_type=jnp.float32) + b_v
        if 0.0 <= slope <= 1.0:
            # max(v1, slope*v1) == leaky_relu(v1) for 0 <= slope <= 1.
            o_ref[...] = jnp.maximum(v1, v1 * slope)
        else:
            # Preserve exact torch.where semantics for any other slope.
            o_ref[...] = jnp.where(v1 > 0, v1, v1 * slope)

    out_pad = pl.pallas_call(
        kernel,
        out_shape=jax.ShapeDtypeStruct((n_p, out_p), jnp.float32),
        in_specs=[
            pl.BlockSpec(memory_space=pltpu.MemorySpace.VMEM),  # x
            pl.BlockSpec(memory_space=pltpu.MemorySpace.VMEM),  # w
            pl.BlockSpec(memory_space=pltpu.MemorySpace.VMEM),  # b
        ],
        out_specs=pl.BlockSpec(memory_space=pltpu.MemorySpace.VMEM),
        cost_estimate=pl.CostEstimate(
            flops=2 * n_p * in_p * out_p,
            bytes_accessed=4 * (n_p * in_p + in_p * out_p + out_p + n_p * out_p),
            transcendentals=0,
        ),
    )(x_pad, w_pad, b_pad)

    return out_pad[:N, :out_features]


if __name__ == "__main__":
    key = jax.random.PRNGKey(0)
    kx, kw, kb = jax.random.split(key, 3)

    N, IN, OUT = 12, 10, 10
    negative_slope = 0.01

    x1 = jax.random.normal(kx, (N, IN), dtype=jnp.float32)
    # Deterministic "Linear(10, 10)" parameters (PyTorch stores W as (OUT, IN)).
    W = jax.random.normal(kw, (OUT, IN), dtype=jnp.float32) * 0.1
    b = jax.random.normal(kb, (OUT,), dtype=jnp.float32) * 0.1

    # One-time weight layout preparation (no per-call transpose).
    w_pad, b_pad = prepare_linear_params(W, b)

    out = linear_leaky_relu(x1, w_pad, b_pad, negative_slope, OUT)
    out = jax.block_until_ready(out)

    # Reference check in plain JAX.
    v1 = x1 @ W.T + b
    ref = jnp.where(v1 > 0, v1, v1 * negative_slope)
    assert out.shape == (N, OUT)
    assert jnp.allclose(out, ref, atol=1e-5, rtol=1e-5), "mismatch vs reference"

    print("KERNEL_OK")
</pallas_src>

<mosaic_0001>
module attributes {stable_mosaic.version = 11 : i64} {
  func.func @kernel(%arg0: memref<16x128xf32, #tpu.memory_space<vmem>>, %arg1: memref<128x128xf32, #tpu.memory_space<vmem>>, %arg2: memref<1x128xf32, #tpu.memory_space<vmem>>, %arg3: memref<16x128xf32, #tpu.memory_space<vmem>>) attributes {dimension_semantics = [], scalar_prefetch = 0 : i64, scratch_operands = 0 : i64, tpu.core_type = #tpu.core_type<tc>} {
    %c0 = arith.constant 0 : index
    %c0_0 = arith.constant 0 : index
    %0 = vector.load %arg0[%c0, %c0_0] : memref<16x128xf32, #tpu.memory_space<vmem>>, vector<16x128xf32>
    %c0_1 = arith.constant 0 : index
    %c0_2 = arith.constant 0 : index
    %1 = vector.load %arg1[%c0_1, %c0_2] : memref<128x128xf32, #tpu.memory_space<vmem>>, vector<128x128xf32>
    %c0_3 = arith.constant 0 : index
    %c0_4 = arith.constant 0 : index
    %2 = vector.load %arg2[%c0_3, %c0_4] : memref<1x128xf32, #tpu.memory_space<vmem>>, vector<1x128xf32>
    %cst = arith.constant dense<0.000000e+00> : vector<16x128xf32>
    %3 = tpu.matmul %0, %1, %cst {dimension_numbers = #tpu.dot_dimension_numbers<[1], [0], [0], [1], [0, 0, 1, 1], [], []>} : vector<16x128xf32>, vector<128x128xf32>, vector<16x128xf32> -> vector<16x128xf32>
    %4 = vector.broadcast %2 : vector<1x128xf32> to vector<16x128xf32>
    %5 = arith.addf %3, %4 : vector<16x128xf32>
    %cst_5 = arith.constant 0.00999999977 : f32
    %6 = vector.broadcast %cst_5 : f32 to vector<16x128xf32>
    %7 = arith.mulf %5, %6 : vector<16x128xf32>
    %8 = arith.maximumf %5, %7 : vector<16x128xf32>
    %c0_6 = arith.constant 0 : index
    %c0_7 = arith.constant 0 : index
    %9 = vector.load %arg3[%c0_6, %c0_7] : memref<16x128xf32, #tpu.memory_space<vmem>>, vector<16x128xf32>
    tpu.vector_store %arg3[%c0_6, %c0_7], %8 {strides = array<i32>} : memref<16x128xf32, #tpu.memory_space<vmem>>, vector<16x128xf32>,
    return
  }
}

</mosaic_0001>

<bundles_post_ra>
// kernel: linear_leaky_relu.1
= control target key start
LH: loop header
LB: loop body
LE: loop exit
PB: predicated region body
PF: predicated region fallthrough
CT: control target
= control target key end

     0   :  { %8 = vsyncpa [#allocation3], 0  ;;  %s353_s0 = inlined_call_operand.vmem [shape: f32[16,128], index: 0, kind: input, shape index: {}]   ;;  %s354_s1 = inlined_call_operand.hbm [shape: f32[128,128], index: 1, kind: input, shape index: {}]   ;;  %s355_s2 = inlined_call_operand.vmem [shape: f32[1,128], index: 2, kind: input, shape index: {}]   ;;  %s356_s3 = inlined_call_operand.hbm [shape: f32[16,128], index: 3, kind: output, shape index: {}]  }
   0x1   :  { %9 = vsyncpa [#allocation4], 0  ;;  %s290_s12 = smov [#allocation2]   ;;  %s242_s16 = scalar_lea.hbm %s354_s1, 2048 }
   0x2   :  { %s17_s13 = sshll.u32 %s290_s12, 4  ;;  %p243_p0 = scmp.ne.s32.totalorder %s354_s1, %s242_s16  ;;  %s18_s13 = int_to_ptr.vmem [resolvable:$true] %s17_s13 }
   0x3   :  { %p246_p1 = scmp.lt.u32.totalorder %s242_s16, %s354_s1 }
   0x5   :  { %p248_p2 = pnand %p246_p1, %p243_p0 }
   0x7   :  { %251 = shalt.err (!%p248_p2)
}
   0x8   :  { %s252_s21 = scalar_lea.vmem %s18_s13, 2048  ;;  %p257_p4 = scmp.lt.s32.totalorder %s18_s13, %s18_s13 }
   0x9   :  { %p253_p3 = scmp.ne.s32.totalorder %s18_s13, %s252_s21  ;;  %p258_p5 = scmp.lt.s32.totalorder %s252_s21, %s252_s21 }
   0xb   :  { %p259_p6 = por %p258_p5, %p257_p4 }
   0xd   :  { %p260_p7 = pnand %p259_p6, %p253_p3 }
   0xf   :  { %263 = shalt.err (!%p260_p7)
}
  0x10   :  { %s291_s22 = smov 128   ;;  %s292_s23 = smov 8  }
  0x11   :  { %23 = dma.hbm_to_vmem [thread:$0]  %s354_s1, 2048, %s18_s13, [#allocation3], %s291_s22, %s291_s22, %s292_s23  }
  0x12   :  { %286 = dma.done.wait [#allocation3], 2048  }
  0x13   :  { %287 = vsyncadd [#allocation3], 4294965248  ;;  %v31_v0 = vld [vmem:[#allocation2] sm:$0xff]  ;;  %v32_v1 = vld [vmem:[#allocation2 + $0x8] sm:$0xff]  ;;  %s293_s4 = smov [#allocation5]  }
  0x14   :  { %v33_v2 = vld [vmem:[#allocation2 + $0x10] sm:$0xff]  ;;  %v206_v3 = vpack.c.bf16 %v32_v1, %v31_v0  ;;  %v34_v4 = vld [vmem:[#allocation2 + $0x18] sm:$0xff]  ;;  %v35_v6 = vld [vmem:[#allocation2 + $0x20] sm:$0xff]  ;;  %s140_s5 = sshll.u32 %s293_s4, 4  ;;  %s141_s5 = int_to_ptr.vmem [resolvable:$true] %s140_s5 }
  0x15   :  { %v210_v5 = vpack.c.bf16 %v34_v4, %v33_v2  ;;  %v36_v7 = vld [vmem:[#allocation2 + $0x28] sm:$0xff]  ;;  %v29_v9 = vld [vmem:[%s353_s0] sm:$0xff]  ;;  %v38_v11 = vld [vmem:[#allocation2 + $0x38] sm:$0xff]  ;;  %s264_s6 = scalar_lea.vmem %s141_s5, 256  ;;  %p269_p9 = scmp.lt.s32.totalorder %s141_s5, %s141_s5 }
  0x16   :  { %207 = vmatprep.subr.bf16.mxu0 %v206_v3  ;;  %v214_v8 = vpack.c.bf16 %v36_v7, %v35_v6  ;;  %v37_v10 = vld [vmem:[#allocation2 + $0x30] sm:$0xff]  ;;  %203 = vmatprep.mubr.f32.mxu0 %v29_v9  ;;  %v39_v13 = vld [vmem:[#allocation2 + $0x40] sm:$0xff]  ;;  %v40_v14 = vld [vmem:[#allocation2 + $0x48] sm:$0xff]  ;;  %p265_p8 = scmp.ne.s32.totalorder %s141_s5, %s264_s6  ;;  %p270_p10 = scmp.lt.s32.totalorder %s264_s6, %s264_s6 }
  0x17   :  { %209 = vmatpush3.bf16.msra.mxu0 %v206_v3  ;;  %v218_v12 = vpack.c.bf16 %v38_v11, %v37_v10  ;;  %v222_v15 = vpack.c.bf16 %v40_v14, %v39_v13  ;;  %v41_v16 = vld [vmem:[#allocation2 + $0x50] sm:$0xff]  ;;  %v42_v17 = vld [vmem:[#allocation2 + $0x58] sm:$0xff]  ;;  %v43_v19 = vld [vmem:[#allocation2 + $0x60] sm:$0xff] }
  0x18   :  { %211 = vmatprep.subr.bf16.mxu0 %v210_v5  ;;  %v226_v18 = vpack.c.bf16 %v42_v17, %v41_v16  ;;  %v44_v20 = vld [vmem:[#allocation2 + $0x68] sm:$0xff]  ;;  %v45_v22 = vld [vmem:[#allocation2 + $0x70] sm:$0xff]  ;;  %v46_v23 = vld [vmem:[#allocation2 + $0x78] sm:$0xff]  ;;  %p271_p11 = por %p270_p10, %p269_p9 }
  0x19   :  { %v230_v21 = vpack.c.bf16 %v44_v20, %v43_v19  ;;  %v234_v24 = vpack.c.bf16 %v46_v23, %v45_v22  ;;  %v30_v25 = vld [vmem:[%s353_s0 + $0x8] sm:$0xff]  ;;  %v152_v26 = vld [vmem:[%s355_s2] ss:$0 sm:$0xff] }
  0x1a   :  { %p272_p12 = pnand %p271_p11, %p265_p8 }
  0x1b   :  { %213 = vmatpush3.bf16.msra.mxu0 %v210_v5 }
  0x1c   :  { %215 = vmatprep.subr.bf16.mxu0 %v214_v8 }
  0x1f   :  { %217 = vmatpush3.bf16.msra.mxu0 %v214_v8 }
  0x20   :  { %219 = vmatprep.subr.bf16.mxu0 %v218_v12 }
  0x23   :  { %221 = vmatpush3.bf16.msra.mxu0 %v218_v12 }
  0x24   :  { %223 = vmatprep.subr.bf16.mxu0 %v222_v15 }
  0x27   :  { %225 = vmatpush3.bf16.msra.mxu0 %v222_v15 }
  0x28   :  { %227 = vmatprep.subr.bf16.mxu0 %v226_v18 }
  0x2b   :  { %229 = vmatpush3.bf16.msra.mxu0 %v226_v18 }
  0x2c   :  { %231 = vmatprep.subr.bf16.mxu0 %v230_v21 }
  0x2f   :  { %233 = vmatpush3.bf16.msra.mxu0 %v230_v21 }
  0x30   :  { %235 = vmatprep.subr.bf16.mxu0 %v234_v24 }
  0x33   :  { %237 = vmatpush3.bf16.msra.mxu0 %v234_v24 }
  0x36   :  { %204 = vmatmul.mubr.f32.vlgmr.msra.gmra.mrb[0].mxu0 %v30_v25 }
 0x109   :  { %v205_v27 = vpop.f32.mrb[0].mxu0 }
 0x10a   :  { %v126_v28 = vadd.f32 %v205_v27, %v152_v26  ;;  %v120_v29 = vpop.f32.mrb[1].mxu0 }
 0x10b   :  { %v121_v30 = vadd.f32 %v152_v26, %v120_v29 }
 0x10c   :  { %v130_v31 = vmul.f32 0.01, %v126_v28 }
 0x10d   :  { %v129_v32 = vmul.f32 0.01, %v121_v30 }
 0x10e   :  { %v132_v33 = vmax.f32 %v126_v28, %v130_v31 }
 0x10f   :  { %v131_v34 = vmax.f32 %v121_v30, %v129_v32 }
 0x110   :  { %134 = vst [vmem:[#allocation5 + $0x8] sm:$0xff] %v132_v33 }
 0x111   :  { %133 = vst [vmem:[#allocation5] sm:$0xff] %v131_v34 }
 0x112   :  { %275 = shalt.err (!%p272_p12)
}
 0x113   :  { %s276_s7 = scalar_lea.hbm %s356_s3, 256 }
 0x114   :  { %p277_p13 = scmp.ne.s32.totalorder %s356_s3, %s276_s7  ;;  %p280_p0 = scmp.lt.u32.totalorder %s276_s7, %s356_s3 }
 0x116   :  { %p282_p1 = pnand %p280_p0, %p277_p13 }
 0x118   :  { %285 = shalt.err (!%p282_p1)
}
 0x119   :  { %146 = dma.vmem_to_hbm [thread:$0]  %s141_s5, 256, %s356_s3, [#allocation4], %s291_s22, %s291_s22, %s292_s23  }
 0x11a   :  { %288 = dma.done.wait [#allocation4], 256  }
 0x11b   :  { %289 = vsyncadd [#allocation4], 4294967040 }
 0x11c   :  { %150 = vsyncpa [#allocation3], 1 }
 0x11d   :  { %151 = vsyncpa [#allocation4], 1 }

</bundles_post_ra>
